<compile_context>
chip_gen: v7x
topology: tpu7x:2x2x1
jax: 0.10.0
libtpu: 0.0.40
codegen_flags: <defaults>
</compile_context>

<pallas_src>
import jax
import jax.numpy as jnp
from jax import lax
from jax.experimental import pallas as pl
from jax.experimental.pallas import tpu as pltpu


# ----------------------------------------------------------------------------
# Block sizing
# ----------------------------------------------------------------------------
def _pick_row_block(total_rows, w, itemsize, target_bytes=2 * 1024 * 1024):
    """Rows per grid step.

    Must be even (2x2 windows stay intact), a multiple of 16 so both the input
    block and the half-height output block are 8-row (sublane) aligned, sized
    for ~2 MiB input blocks, and capped at half the rows so at least two
    'parallel' grid steps exist (v7x megacore / 2 TensorCores).
    """
    if total_rows % 16 != 0 or total_rows <= 32:
        return total_rows                      # single full block
    rb = min(total_rows // 2, max(16, target_bytes // (w * itemsize)))
    rb -= rb % 16
    return max(rb, 16)


# ----------------------------------------------------------------------------
# Primary kernel: strided loads + XLU transpose, no MXU
# ----------------------------------------------------------------------------
def _transpose_pool_kernel(x_ref, o_ref, t_ref):
    r2, wo = o_ref.shape
    # 2x1 pooling along rows (sublane axis): stride-2 row loads + VPU max.
    top = x_ref[pl.ds(0, r2, 2), :]            # rows 0, 2, 4, ...
    bot = x_ref[pl.ds(1, r2, 2), :]            # rows 1, 3, 5, ...
    rmax = jnp.maximum(top, bot).astype(jnp.float32)        # (r2, W)
    # 1x2 pooling along columns (lane axis): put columns on sublanes with an
    # XLU transpose, pool with stride-2 row loads from VMEM scratch, transpose
    # back.  XLU volume ~0.75x of the block; hides under the HBM DMA.
    t_ref[...] = rmax.T                                     # (W, r2)
    even = t_ref[pl.ds(0, wo, 2), :]                        # cols 0, 2, 4, ...
    odd = t_ref[pl.ds(1, wo, 2), :]                         # cols 1, 3, 5, ...
    o_ref[...] = jnp.maximum(even, odd).T.astype(o_ref.dtype)   # (r2, wo)


def _pool_rows_transpose(xr, rb, wo):
    rows, w = xr.shape
    return pl.pallas_call(
        _transpose_pool_kernel,
        out_shape=jax.ShapeDtypeStruct((rows // 2, wo), xr.dtype),
        grid=(pl.cdiv(rows, rb),),
        in_specs=[pl.BlockSpec((rb, w), lambda i: (i, 0))],
        out_specs=pl.BlockSpec((rb // 2, wo), lambda i: (i, 0)),
        scratch_shapes=[pltpu.VMEM((w, rb // 2), jnp.float32)],
        compiler_params=pltpu.CompilerParams(
            dimension_semantics=("parallel",),
            vmem_limit_bytes=32 * 1024 * 1024),
    )(xr)


# ----------------------------------------------------------------------------
# Fallback kernel: hoisted one-hot compaction on the MXU (selector is a
# constant input loaded once and resident; single matmul).  Only used if the
# transpose path fails to lower.  NOTE: 0*(NaN/inf) in the dot can spread
# non-finite values across a row, unlike true max pooling.
# ----------------------------------------------------------------------------
def _onehot_pool_kernel(sel_ref, x_ref, o_ref):
    r2, wo = o_ref.shape
    top = x_ref[pl.ds(0, r2, 2), :]
    bot = x_ref[pl.ds(1, r2, 2), :]
    rmax = jnp.maximum(top, bot).astype(jnp.float32)        # (r2, W)
    picked = jnp.dot(rmax, sel_ref[...],
                     preferred_element_type=jnp.float32,
                     precision=lax.Precision.HIGHEST)       # (r2, 2*wo)
    o_ref[...] = jnp.maximum(picked[:, :wo], picked[:, wo:]).astype(o_ref.dtype)


def _pool_rows_onehot(xr, rb, wo):
    rows, w = xr.shape
    w_idx = jnp.arange(w, dtype=jnp.int32)[:, None]
    j_idx = jnp.arange(wo, dtype=jnp.int32)[None, :]
    sel = jnp.concatenate([(w_idx == 2 * j_idx), (w_idx == 2 * j_idx + 1)],
                          axis=1).astype(jnp.float32)       # (w, 2*wo), built once
    return pl.pallas_call(
        _onehot_pool_kernel,
        out_shape=jax.ShapeDtypeStruct((rows // 2, wo), xr.dtype),
        grid=(pl.cdiv(rows, rb),),
        in_specs=[pl.BlockSpec((w, 2 * wo), lambda i: (0, 0)),   # resident selector
                  pl.BlockSpec((rb, w), lambda i: (i, 0))],
        out_specs=pl.BlockSpec((rb // 2, wo), lambda i: (i, 0)),
        compiler_params=pltpu.CompilerParams(
            dimension_semantics=("parallel",),
            vmem_limit_bytes=32 * 1024 * 1024),
    )(sel, xr)


# ----------------------------------------------------------------------------
# Wrapper
# ----------------------------------------------------------------------------
_USE_TRANSPOSE_PATH = None  # resolved by a one-time eager capability probe


def maxpool2d_2x2(x):
    """2x2 / stride-2 max pool over NCHW input via a Pallas TPU kernel."""
    global _USE_TRANSPOSE_PATH
    N, C, H, W = x.shape
    if H % 2 or W % 2:
        raise ValueError("H and W must be even for 2x2/stride-2 pooling")
    Ho, Wo = H // 2, W // 2

    total_rows = N * C * H
    xr = x.reshape(total_rows, W)                 # free row-major view
    rb = _pick_row_block(total_rows, W, x.dtype.itemsize)

    if _USE_TRANSPOSE_PATH is None:
        # One-time probe (the demo runs eagerly, so lowering errors are
        # catchable here).  Falls back to the one-hot MXU compaction only if
        # the small-shape transpose is rejected by this compiler version.
        try:
            out = _pool_rows_transpose(xr, rb, Wo)
            out.block_until_ready()
            _USE_TRANSPOSE_PATH = True
            return out.reshape(N, C, Ho, Wo)
        except Exception:
            _USE_TRANSPOSE_PATH = False

    if _USE_TRANSPOSE_PATH:
        out = _pool_rows_transpose(xr, rb, Wo)
    else:
        out = _pool_rows_onehot(xr, rb, Wo)
    return out.reshape(N, C, Ho, Wo)


class Down2dWrapper:
    """JAX/Pallas port of the PyTorch Down2dWrapper module (no parameters)."""

    def __init__(self, down="maxpool"):
        if down not in ("maxpool", "maxpool_unpool", "conv"):
            raise ValueError("Downsample method not supported!")
        self.down = down
        self.pool_idx = None

    def __call__(self, x):
        if self.down == "maxpool":
            return maxpool2d_2x2(x)
        elif self.down == "maxpool_unpool":
            # PyTorch forward() returns only the pooled values in this mode.
            # TODO(synk): pool_idx (return_indices=True) side-output not materialized.
            return maxpool2d_2x2(x)
        else:  # 'conv' -> identity pass-through
            return x


if __name__ == "__main__":
    key = jax.random.PRNGKey(0)
    x = jax.random.normal(key, (2, 4, 16, 16), dtype=jnp.float32)

    # default mode: 'maxpool'
    mod = Down2dWrapper(down="maxpool")
    y = jax.block_until_ready(mod(x))
    assert y.shape == (2, 4, 8, 8) and y.dtype == x.dtype

    # pure-JAX reference for 2x2 / stride-2 max pooling
    ref = jnp.max(x.reshape(2, 4, 8, 2, 8, 2), axis=(3, 5))
    assert jnp.array_equal(y, ref), "Pallas maxpool mismatch"

    # 'maxpool_unpool' mode returns the same pooled values
    y2 = jax.block_until_ready(Down2dWrapper(down="maxpool_unpool")(x))
    assert jnp.array_equal(y2, ref)

    # 'conv' mode is identity
    y3 = jax.block_until_ready(Down2dWrapper(down="conv")(x))
    assert jnp.array_equal(y3, x)

    print("KERNEL_OK")
</pallas_src>

<mosaic_0001>
module attributes {stable_mosaic.version = 11 : i64} {
  func.func @_transpose_pool_kernel(%arg0: i32, %arg1: memref<64x16xf32, #tpu.memory_space<vmem>>, %arg2: memref<32x8xf32, #tpu.memory_space<vmem>>, %arg3: memref<16x32xf32, #tpu.memory_space<vmem>>) attributes {dimension_semantics = [#tpu.dimension_semantics<parallel>], iteration_bounds = array<i64: 2>, scalar_prefetch = 0 : i64, scratch_operands = 1 : i64, tpu.core_type = #tpu.core_type<tc>, window_params = [{transform_indices = @transform_0, window_bounds = array<i64: 64, 16>}, {transform_indices = @transform_1, window_bounds = array<i64: 32, 8>}]} {
    %c0 = arith.constant 0 : index
    %c0_0 = arith.constant 0 : index
    %0 = tpu.strided_load %arg1[%c0, %c0_0] {strides = array<i32: 2, 1>} : memref<64x16xf32, #tpu.memory_space<vmem>>, vector<32x16xf32>
    %c1 = arith.constant 1 : index
    %c0_1 = arith.constant 0 : index
    %1 = tpu.strided_load %arg1[%c1, %c0_1] {strides = array<i32: 2, 1>} : memref<64x16xf32, #tpu.memory_space<vmem>>, vector<32x16xf32>
    %2 = arith.maximumf %0, %1 : vector<32x16xf32>
    %3 = tpu.transpose %2, [1, 0] : vector<32x16xf32> -> vector<16x32xf32>
    %c0_2 = arith.constant 0 : index
    %c0_3 = arith.constant 0 : index
    %4 = vector.load %arg3[%c0_2, %c0_3] : memref<16x32xf32, #tpu.memory_space<vmem>>, vector<16x32xf32>
    tpu.vector_store %arg3[%c0_2, %c0_3], %3 {strides = array<i32>} : memref<16x32xf32, #tpu.memory_space<vmem>>, vector<16x32xf32>,
    %c0_4 = arith.constant 0 : index
    %c0_5 = arith.constant 0 : index
    %5 = tpu.strided_load %arg3[%c0_4, %c0_5] {strides = array<i32: 2, 1>} : memref<16x32xf32, #tpu.memory_space<vmem>>, vector<8x32xf32>
    %c1_6 = arith.constant 1 : index
    %c0_7 = arith.constant 0 : index
    %6 = tpu.strided_load %arg3[%c1_6, %c0_7] {strides = array<i32: 2, 1>} : memref<16x32xf32, #tpu.memory_space<vmem>>, vector<8x32xf32>
    %7 = arith.maximumf %5, %6 : vector<8x32xf32>
    %8 = tpu.transpose %7, [1, 0] : vector<8x32xf32> -> vector<32x8xf32>
    %c0_8 = arith.constant 0 : index
    %c0_9 = arith.constant 0 : index
    %9 = vector.load %arg2[%c0_8, %c0_9] : memref<32x8xf32, #tpu.memory_space<vmem>>, vector<32x8xf32>
    tpu.vector_store %arg2[%c0_8, %c0_9], %8 {strides = array<i32>} : memref<32x8xf32, #tpu.memory_space<vmem>>, vector<32x8xf32>,
    return
  }
  func.func @transform_0(%arg0: i32) -> (i32, i32) {
    %c0_i32 = arith.constant 0 : i32
    %c0_i32_0 = arith.constant 0 : i32
    return %arg0, %c0_i32 : i32, i32
  }
  func.func @transform_1(%arg0: i32) -> (i32, i32) {
    %c0_i32 = arith.constant 0 : i32
    %c0_i32_0 = arith.constant 0 : i32
    return %arg0, %c0_i32 : i32, i32
  }
}

module attributes {stable_mosaic.version = 11 : i64} {
  func.func @_onehot_pool_kernel(%arg0: i32, %arg1: memref<16x16xf32, #tpu.memory_space<vmem>>, %arg2: memref<64x16xf32, #tpu.memory_space<vmem>>, %arg3: memref<32x8xf32, #tpu.memory_space<vmem>>) attributes {dimension_semantics = [#tpu.dimension_semantics<parallel>], iteration_bounds = array<i64: 2>, scalar_prefetch = 0 : i64, scratch_operands = 0 : i64, tpu.core_type = #tpu.core_type<tc>, window_params = [{pipeline_mode = #tpu.pipeline_mode<synchronous>, transform_indices = @transform_0, window_bounds = array<i64: 16, 16>}, {transform_indices = @transform_1, window_bounds = array<i64: 64, 16>}, {transform_indices = @transform_2, window_bounds = array<i64: 32, 8>}]} {
    %c0 = arith.constant 0 : index
    %c0_0 = arith.constant 0 : index
    %0 = tpu.strided_load %arg2[%c0, %c0_0] {strides = array<i32: 2, 1>} : memref<64x16xf32, #tpu.memory_space<vmem>>, vector<32x16xf32>
    %c1 = arith.constant 1 : index
    %c0_1 = arith.constant 0 : index
    %1 = tpu.strided_load %arg2[%c1, %c0_1] {strides = array<i32: 2, 1>} : memref<64x16xf32, #tpu.memory_space<vmem>>, vector<32x16xf32>
    %2 = arith.maximumf %0, %1 : vector<32x16xf32>
    %c0_2 = arith.constant 0 : index
    %c0_3 = arith.constant 0 : index
    %3 = vector.load %arg1[%c0_2, %c0_3] : memref<16x16xf32, #tpu.memory_space<vmem>>, vector<16x16xf32>
    %cst = arith.constant dense<0.000000e+00> : vector<32x16xf32>
    %4 = tpu.matmul %2, %3, %cst {dimension_numbers = #tpu.dot_dimension_numbers<[1], [0], [0], [1], [0, 0, 1, 1], [], []>, precision = #tpu.contract_precision<fp32>} : vector<32x16xf32>, vector<16x16xf32>, vector<32x16xf32> -> vector<32x16xf32>
    %5 = vector.extract_strided_slice %4 {offsets = [0, 0], sizes = [32, 8], strides = [1, 1]} : vector<32x16xf32> to vector<32x8xf32>
    %6 = vector.extract_strided_slice %4 {offsets = [0, 8], sizes = [32, 8], strides = [1, 1]} : vector<32x16xf32> to vector<32x8xf32>
    %7 = arith.maximumf %5, %6 : vector<32x8xf32>
    %c0_4 = arith.constant 0 : index
    %c0_5 = arith.constant 0 : index
    %8 = vector.load %arg3[%c0_4, %c0_5] : memref<32x8xf32, #tpu.memory_space<vmem>>, vector<32x8xf32>
    tpu.vector_store %arg3[%c0_4, %c0_5], %7 {strides = array<i32>} : memref<32x8xf32, #tpu.memory_space<vmem>>, vector<32x8xf32>,
    return
  }
  func.func @transform_0(%arg0: i32) -> (i32, i32) {
    %c0_i32 = arith.constant 0 : i32
    %c0_i32_0 = arith.constant 0 : i32
    %c0_i32_1 = arith.constant 0 : i32
    return %c0_i32, %c0_i32_0 : i32, i32
  }
  func.func @transform_1(%arg0: i32) -> (i32, i32) {
    %c0_i32 = arith.constant 0 : i32
    %c0_i32_0 = arith.constant 0 : i32
    return %arg0, %c0_i32 : i32, i32
  }
  func.func @transform_2(%arg0: i32) -> (i32, i32) {
    %c0_i32 = arith.constant 0 : i32
    %c0_i32_0 = arith.constant 0 : i32
    return %arg0, %c0_i32 : i32, i32
  }
}

</mosaic_0001>

<bundles_post_ra>
// kernel: tpu_custom_call.1
= control target key start
LH: loop header
LB: loop body
LE: loop exit
PB: predicated region body
PF: predicated region fallthrough
CT: control target
= control target key end

     0   :  { %s316_s6 = smov 0   ;;  %s337_s0 = inlined_call_operand.vmem [shape: f32[128,16], index: 0, kind: input, shape index: {}]   ;;  %s338_s1 = inlined_call_operand.vmem [shape: f32[64,8], index: 1, kind: output, shape index: {}]  }
   0x1 LB: > { %s271_s7 = sadd.s32 4294967295, %s304_s6   ;;  %p275_p0 = scmp.ge.s32.totalorder %s304_s6, 1  ;;  %s304_s6 = sphi %s316_s6, %s11_s6  }
   0x2   : > { %p88_p1 = scmp.lt.s32.totalorder %s304_s6, 3 }
   0x4   : > { %p89_p2 = pnand %p275_p0, %p88_p1 }
   0x5   : > { %s276_s8 = sshll.u32 (!%p89_p2), %s271_s7, 3  ;;  %vm171_vm0 = vcmask (!%p89_p2), 261120   ;;  %s278_s13 = sshll.u32 (!%p89_p2), %s271_s7, 2  ;;  %vm210_vm1 = vcmask (!%p89_p2), 64512  }
   0x6   : > { %92 = sbr.rel (%p89_p2) target bundleno = 304 (0x130), region = 24  ;;  %p109_p3 = scmp.lt.s32.totalorder (!%p89_p2), %s276_s8, 15 }
   0x7   : > { %p115_p4 = scmp.lt.s32.totalorder (!%p89_p2), %s278_s13, 7 }
   0xd   : > { %s340_s8 = smov (!%p109_p3, %s276_s8), 15  ;;  %s342_s13 = smov (!%p115_p4, %s278_s13), 7 }
   0xe   : > { %s277_s9 = sshll.u32 %s340_s8, 3  ;;  %s279_s14 = sshll.u32 %s342_s13, 3 }
   0xf   : > { %s112_s12 = scalar_lea.vmem %s337_s0, %s277_s9  ;;  %s118_s17 = scalar_lea.vmem %s338_s1, %s279_s14 }
  0x10   : > { %v120_v0 = vld [vmem:[%s112_s12] ss:$2 sm:$0xff]  ;;  %v283_v1 = vld [vmem:[%s112_s12 + $0x1] ss:$2 sm:$0xff]  ;;  %v280_v2 = vld [vmem:[%s112_s12 + $0x10] ss:$2 sm:$0xff] }
  0x11   : > { %v135_v3 = vmax.f32 %v120_v0, %v283_v1  ;;  %v284_v4 = vld [vmem:[%s112_s12 + $0x11] ss:$2 sm:$0xff]  ;;  %v281_v6 = vld [vmem:[%s112_s12 + $0x20] ss:$2 sm:$0xff]  ;;  %v285_v7 = vld [vmem:[%s112_s12 + $0x21] ss:$2 sm:$0xff] }
  0x12   : > { %v136_v5 = vmax.f32 %v280_v2, %v284_v4  ;;  %v137_v8 = vmax.f32 %v281_v6, %v285_v7  ;;  %v282_v9 = vld [vmem:[%s112_s12 + $0x30] ss:$2 sm:$0xff]  ;;  %v286_v10 = vld [vmem:[%s112_s12 + $0x31] ss:$2 sm:$0xff] }
  0x13   : > { %139 = vxpose.xlu0.b32.start [1/4] (short) (narrow) %v135_v3, 16  ;;  %v138_v11 = vmax.f32 %v282_v9, %v286_v10 }
  0x17   : > { %140 = vxpose.xlu0.b32.cont [2/4] (short) (narrow) %v136_v5, 16 }
  0x1b   : > { %141 = vxpose.xlu0.b32.cont [3/4] (short) (narrow) %v137_v8, 16 }
  0x1f   : > { %142 = vxpose.xlu0.b32.end [4/4] (short) (narrow) %v138_v11, 16 }
  0x93   : > { %v155_v12 = vpop.trf.xlu0 }
  0x94   : > { %172 = vst.msk [vmem:[#allocation2] sm:$0xff] %vm171_vm0, %v155_v12 }
  0x97   : > { %v156_v13 = vpop.trf.xlu0 }
  0x98   : > { %173 = vst.msk [vmem:[#allocation2 + $0x8] sm:$0xff] %vm171_vm0, %v156_v13 }
  0x9f   : > { %v174_v14 = vld [vmem:[#allocation2] ss:$2 sm:$0xff]  ;;  %v176_v15 = vld [vmem:[#allocation2 + $0x1] ss:$2 sm:$0xff] }
  0xa0   : > { %v177_v16 = vmax.f32 %v174_v14, %v176_v15 }
  0xa2   : > { %178 = vxpose.xlu1.b32.start.end [1/1] (short) (narrow) %v177_v16, 32 }
 0x122   : > { %v194_v17 = vpop.trf.xlu1 }
 0x123   : > { %211 = vst.msk [vmem:[%s118_s17] sm:$0xff] %vm210_vm1, %v194_v17 }
 0x126   : > { %v195_v18 = vpop.trf.xlu1 }
 0x127   : > { %212 = vst.msk [vmem:[%s118_s17 + $0x8] sm:$0xff] %vm210_vm1, %v195_v18 }
 0x12a   : > { %v196_v19 = vpop.trf.xlu1 }
 0x12b   : > { %213 = vst.msk [vmem:[%s118_s17 + $0x10] sm:$0xff] %vm210_vm1, %v196_v19 }
 0x12e   : > { %v197_v20 = vpop.trf.xlu1 }
 0x12f   : > { %214 = vst.msk [vmem:[%s118_s17 + $0x18] sm:$0xff] %vm210_vm1, %v197_v20 }
 0x130 PF: > { %s11_s6 = sadd.s32 1, %s304_s6  }
 0x131   : > { %p8_p5 = scmp.ge.s32.totalorder %s11_s6, 4  }
 0x133   :  { %10 = sbr.rel (!%p8_p5) target bundleno = 1 (0x1), region = 62 }

// kernel: tpu_custom_call.1
= control target key start
LH: loop header
LB: loop body
LE: loop exit
PB: predicated region body
PF: predicated region fallthrough
CT: control target
= control target key end

     0   :  { %s1041_s9 = smov 0   ;;  %s1080_s0 = inlined_call_operand.vmem [shape: f32[16,16], index: 0, kind: input, shape index: {}]   ;;  %s1081_s1 = inlined_call_operand.vmem [shape: f32[128,16], index: 1, kind: input, shape index: {}]   ;;  %s1082_s2 = inlined_call_operand.vmem [shape: f32[64,8], index: 2, kind: output, shape index: {}]  }
   0x1 LB: > { %s850_s10 = sadd.s32 4294967295, %s1023_s9   ;;  %p854_p0 = scmp.ge.s32.totalorder %s1023_s9, 1  ;;  %s1023_s9 = sphi %s1041_s9, %s12_s9  }
   0x2   : > { %p113_p1 = scmp.lt.s32.totalorder %s1023_s9, 3 }
   0x4   : > { %p114_p2 = pnand %p854_p0, %p113_p1 }
   0x5   : > { %v166_v0 = vld [vmem:[%s1080_s0] sm:$0xff] (!%p114_p2)  ;;  %v167_v1 = vld [vmem:[%s1080_s0 + $0x8] sm:$0xff] (!%p114_p2)  ;;  %s855_s15 = sshll.u32 (!%p114_p2), %s850_s10, 3  ;;  %vm168_vm0 = vcmask (!%p114_p2), 130048   ;;  %s1025_s20 = smov (!%p114_p2), 120   ;;  %vm789_vm1 = vcmask (!%p114_p2), 64512  }
   0x6   : > { %117 = sbr.rel (%p114_p2) target bundleno = 388 (0x184), region = 28  ;;  %v182_v2 = vand.u32 (!%p114_p2), 4294901760, %v166_v0  ;;  %v185_v3 = vand.u32 (!%p114_p2), 4294901760, %v167_v1  ;;  %p136_p3 = scmp.lt.s32.totalorder (!%p114_p2), %s855_s15, 15 }
   0x7   : > { %s857_s21 = sshll.u32 (!%p114_p2), %s850_s10, 2 }
   0x8   : > { %v1057_v4 = vpack.c.bf16 (!%p114_p2), %v185_v3, %v182_v2  ;;  %v290_v5 = vsub.f32 (!%p114_p2), %v166_v0, %v182_v2  ;;  %v297_v6 = vsub.f32 (!%p114_p2), %v167_v1, %v185_v3  ;;  %p142_p4 = scmp.lt.s32.totalorder (!%p114_p2), %s857_s21, 7 }
   0xa   : > { %977 = vmatprep.subr.bf16.mxu0 (!%p114_p2), %v1057_v4  ;;  %965 = vmatprep.subr.bf16.mxu1 (!%p114_p2), %v1057_v4  ;;  %v291_v7 = vand.u32 (!%p114_p2), 4294901760, %v290_v5  ;;  %v298_v8 = vand.u32 (!%p114_p2), 4294901760, %v297_v6  ;;  %v972_v50 = vpack.c.bf16 (!%p114_p2), %v297_v6, %v290_v5 }
   0xb   : > { %979 = vmatpush3.bf16.msra.mxu0 (!%p114_p2), %v1057_v4  ;;  %967 = vmatpush3.bf16.msra.mxu1 (!%p114_p2), %v1057_v4 }
   0xc   : > { %v292_v12 = vsub.f32 (!%p114_p2), %v290_v5, %v291_v7  ;;  %v299_v13 = vsub.f32 (!%p114_p2), %v297_v6, %v298_v8  ;;  %v980_v14 = vpack.c.bf16 (!%p114_p2), %v298_v8, %v291_v7 }
   0xd   : > { %s1084_s15 = smov (!%p136_p3, %s855_s15), 15  ;;  %s1086_s21 = smov (!%p142_p4, %s857_s21), 7 }
   0xe   : > { %s856_s16 = sshll.u32 %s1084_s15, 3  ;;  %v293_v20 = vand.u32 4294901760, %v292_v12  ;;  %v300_v21 = vand.u32 4294901760, %v299_v13  ;;  %981 = vmatprep.subr.bf16.mxu0 %v980_v14  ;;  %s858_s22 = sshll.u32 %s1086_s21, 3 }
   0xf   : > { %s139_s19 = scalar_lea.vmem %s1081_s1, %s856_s16  ;;  %s145_s25 = scalar_lea.vmem %s1082_s2, %s858_s22 }
  0x10   : > { %v147_v9 = vld [vmem:[%s139_s19] ss:$2 sm:$0xff]  ;;  %v862_v10 = vld [vmem:[%s139_s19 + $0x1] ss:$2 sm:$0xff]  ;;  %v859_v11 = vld [vmem:[%s139_s19 + $0x10] ss:$2 sm:$0xff]  ;;  %v968_v29 = vpack.c.bf16 %v300_v21, %v293_v20 }
  0x11   : > { %v162_v15 = vmax.f32 %v147_v9, %v862_v10  ;;  %v863_v16 = vld [vmem:[%s139_s19 + $0x11] ss:$2 sm:$0xff]  ;;  %v860_v17 = vld [vmem:[%s139_s19 + $0x20] ss:$2 sm:$0xff]  ;;  %v864_v18 = vld [vmem:[%s139_s19 + $0x21] ss:$2 sm:$0xff] }
  0x12   : > { %v163_v19 = vmax.f32 %v859_v11, %v863_v16  ;;  %v164_v22 = vmax.f32 %v860_v17, %v864_v18  ;;  %v861_v23 = vld [vmem:[%s139_s19 + $0x30] ss:$2 sm:$0xff]  ;;  %v865_v24 = vld [vmem:[%s139_s19 + $0x31] ss:$2 sm:$0xff]  ;;  %969 = vmatprep.subr.bf16.mxu1 %v968_v29 }
  0x13   : > { %v170_v25 = vsel %vm168_vm0, %v162_v15, 0  ;;  %v165_v26 = vmax.f32 %v861_v23, %v865_v24 }
  0x14   : > { %v248_v27 = vand.u32 4294901760, %v170_v25  ;;  %v173_v28 = vsel %vm168_vm0, %v163_v19, 0  ;;  %v176_v30 = vsel %vm168_vm0, %v164_v22, 0 }
  0x15   : > { %v258_v31 = vand.u32 4294901760, %v173_v28  ;;  %v268_v32 = vand.u32 4294901760, %v176_v30  ;;  %v179_v33 = vsel %vm168_vm0, %v165_v26, 0 }
  0x16   : > { %v249_v34 = vsub.f32 %v170_v25, %v248_v27  ;;  %v278_v35 = vand.u32 4294901760, %v179_v33 }
  0x17   : > { %v259_v36 = vsub.f32 %v173_v28, %v258_v31  ;;  %v269_v37 = vsub.f32 %v176_v30, %v268_v32 }
  0x18   : > { %v250_v38 = vand.u32 4294901760, %v249_v34  ;;  %v279_v39 = vsub.f32 %v179_v33, %v278_v35 }
  0x19   : > { %v260_v40 = vand.u32 4294901760, %v259_v36  ;;  %v270_v41 = vand.u32 4294901760, %v269_v37 }
  0x1a   : > { %938 = vmatprep.mubr.f32.mxu0 %v250_v38  ;;  %v251_v42 = vsub.f32 %v249_v34, %v250_v38  ;;  %v280_v43 = vand.u32 4294901760, %v279_v39 }
  0x1b   : > { %939 = vmatmul.mubr.f32.vlgmr.msra.gmra.mrb[0].mxu0 %v260_v40  ;;  %v261_v44 = vsub.f32 %v259_v36, %v260_v40  ;;  %v271_v45 = vsub.f32 %v269_v37, %v270_v41 }
  0x1c   : > { %v252_v46 = vand.u32 4294901760, %v251_v42  ;;  %941 = vmatprep.mubr.f32.mxu0 %v270_v41  ;;  %983 = vmatpush3.bf16.msra.mxu0 %v980_v14  ;;  %v281_v47 = vsub.f32 %v279_v39, %v280_v43 }
  0x1d   : > { %v262_v48 = vand.u32 4294901760, %v261_v44  ;;  %v272_v49 = vand.u32 4294901760, %v271_v45  ;;  %985 = vmatprep.subr.bf16.mxu0 %v1057_v4 }
  0x1e   : > { %908 = vmatprep.mubr.f32.mxu1 %v252_v46  ;;  %v282_v51 = vand.u32 4294901760, %v281_v47 }
  0x1f   : > { %909 = vmatmul.mubr.f32.vlgmr.msra.gmra.mrb[0].mxu1 %v262_v48  ;;  %942 = vmatmul.mubr.f32.gmra.mrb[2].mxu0 %v280_v43 }
  0x20   : > { %971 = vmatpush3.bf16.msra.mxu1 %v968_v29  ;;  %911 = vmatprep.mubr.f32.mxu1 %v272_v49 }
  0x21   : > { %948 = vmatprep.mubr.f32.mxu0 %v248_v27  ;;  %973 = vmatprep.subr.bf16.mxu1 %v972_v50 }
  0x23   : > { %912 = vmatmul.mubr.f32.gmra.mrb[2].mxu1 %v282_v51  ;;  %949 = vmatmul.mubr.f32.vlgmr.msra.gmra.mrb[0].mxu0 %v258_v31 }
  0x24   : > { %918 = vmatprep.mubr.f32.mxu1 %v248_v27  ;;  %951 = vmatprep.mubr.f32.mxu0 %v268_v32 }
  0x25   : > { %987 = vmatpush3.bf16.msra.mxu0 %v1057_v4 }
  0x27   : > { %919 = vmatmul.mubr.f32.vlgmr.msra.gmra.mrb[0].mxu1 %v258_v31  ;;  %952 = vmatmul.mubr.f32.gmra.mrb[2].mxu0 %v278_v35 }
  0x28   : > { %975 = vmatpush3.bf16.msra.mxu1 %v972_v50  ;;  %921 = vmatprep.mubr.f32.mxu1 %v268_v32 }
  0x29   : > { %958 = vmatprep.mubr.f32.mxu0 %v248_v27 }
  0x2b   : > { %922 = vmatmul.mubr.f32.gmra.mrb[2].mxu1 %v278_v35  ;;  %959 = vmatmul.mubr.f32.vlgmr.msra.gmra.mrb[0].mxu0 %v258_v31 }
  0x2c   : > { %928 = vmatprep.mubr.f32.mxu1 %v249_v34  ;;  %961 = vmatprep.mubr.f32.mxu0 %v268_v32 }
  0x2f   : > { %929 = vmatmul.mubr.f32.vlgmr.msra.gmra.mrb[0].mxu1 %v259_v36  ;;  %962 = vmatmul.mubr.f32.gmra.mrb[2].mxu0 %v278_v35 }
  0x30   : > { %931 = vmatprep.mubr.f32.mxu1 %v269_v37 }
  0x33   : > { %932 = vmatmul.mubr.f32.gmra.mrb[2].mxu1 %v279_v39 }
  0xfe   : > { %v960_v52 = vpop.f32.mrb[0].mxu0 }
  0xff   : > { %v747_v53 = vpop.f32.mrb[1].mxu0 }
 0x102   : > { %v930_v54 = vpop.f32.mrb[0].mxu1  ;;  %v963_v55 = vpop.f32.mrb[2].mxu0 }
 0x103   : > { %v988_v56 = vadd.f32 %v960_v52, %v930_v54  ;;  %v459_v57 = vpop.f32.mrb[1].mxu1  ;;  %v759_v58 = vpop.f32.mrb[3].mxu0 }
 0x104   : > { %v989_v59 = vadd.f32 %v747_v53, %v459_v57 }
 0x106   : > { %773 = vrot.lane.b32.xlu0 %v989_v59, %s1025_s20  ;;  %v933_v60 = vpop.f32.mrb[2].mxu1 }
 0x107   : > { %v990_v61 = vadd.f32 %v963_v55, %v933_v60  ;;  %v473_v62 = vpop.f32.mrb[3].mxu1 }
 0x108   : > { %v991_v63 = vadd.f32 %v759_v58, %v473_v62 }
 0x10a   : > { %775 = vrot.lane.b32.xlu0 %v988_v56, %s1025_s20  ;;  %777 = vrot.lane.b32.xlu1 %v991_v63, %s1025_s20 }
 0x10e   : > { %779 = vrot.lane.b32.xlu1 %v990_v61, %s1025_s20 }
 0x178   : > { %v774_v0 = vpop.permute.xlu0 %773 }
 0x179   : > { %v785_v1 = vmax.f32 %v989_v59, %v774_v0 }
 0x17b   : > { %790 = vst.msk [vmem:[%s145_s25] sm:$0xff] %vm789_vm1, %v785_v1 }
 0x17c   : > { %v776_v2 = vpop.permute.xlu0 %775  ;;  %v778_v3 = vpop.permute.xlu1 %777 }
 0x17d   : > { %v786_v4 = vmax.f32 %v988_v56, %v776_v2  ;;  %v787_v5 = vmax.f32 %v991_v63, %v778_v3 }
 0x17f   : > { %791 = vst.msk [vmem:[%s145_s25 + $0x8] sm:$0xff] %vm789_vm1, %v786_v4  ;;  %792 = vst.msk [vmem:[%s145_s25 + $0x10] sm:$0xff] %vm789_vm1, %v787_v5 }
 0x180   : > { %v780_v6 = vpop.permute.xlu1 %779 }
 0x181   : > { %v788_v7 = vmax.f32 %v990_v61, %v780_v6 }
 0x183   : > { %793 = vst.msk [vmem:[%s145_s25 + $0x18] sm:$0xff] %vm789_vm1, %v788_v7 }
 0x184 PF: > { %s12_s9 = sadd.s32 1, %s1023_s9  }
 0x185   : > { %p9_p5 = scmp.ge.s32.totalorder %s12_s9, 4  }
 0x187   :  { %11 = sbr.rel (!%p9_p5) target bundleno = 1 (0x1), region = 65 }

</bundles_post_ra>
